<compile_context>
chip_gen: v5e
topology: v5e:2x2
jax: 0.10.0
libtpu: 0.0.40
codegen_flags: <defaults>
</compile_context>

<pallas_src>
import functools

import numpy as np
import jax
import jax.numpy as jnp
from jax.experimental import pallas as pl
from jax.experimental.pallas import tpu as pltpu


def _maxpool_s1_kernel(colmask_ref, rowmask_ref, x_ref, o_ref, *, khw, w):
    # colmask/rowmask: (1, KHW) int32 (1 where the right/down neighbour is real,
    # 0 on the replicate edge).  x/o: (TB, KHW).  Everything is register-resident.
    x = x_ref[...]
    col_ok = colmask_ref[...] != 0          # (1, KHW) -> broadcasts over TB
    row_ok = rowmask_ref[...] != 0

    # Horizontal step: m[i, p] = max(x[i, p], x[i, p_right])
    # roll(x, khw-1) == jnp.roll(x, -1): element p+1 lands at p; every wrap /
    # cross-slice position has col == W-1 and is replaced by x via the mask.
    right = pltpu.roll(x, khw - 1, axis=1)
    m = jnp.maximum(x, jnp.where(col_ok, right, x))

    # Vertical step: o[i, p] = max(m[i, p], m[i, p_down])
    down = pltpu.roll(m, khw - w, axis=1)   # == jnp.roll(m, -W)
    o_ref[...] = jnp.maximum(m, jnp.where(row_ok, down, m))


def _choose_fuse(n_rows, hw):
    """Number of image slices fused per logical row (lane-density restore)."""
    def frac_pad(elems):
        return ((-elems) % 128) / elems
    best_k, best = 1, frac_pad(hw)
    if best == 0.0:
        return 1
    for k in range(2, 9):
        if n_rows % k:
            continue
        f = frac_pad(k * hw)
        if f + 1e-12 < best:
            best_k, best = k, f
    return best_k


def _choose_tb(n_rows, row_elems, itemsize):
    """Sublane (second-to-last) block extent.

    Priority: (1) ~2 MiB blocks, (2) >=2 grid steps when possible (pipelining,
    v7x megacore sharding of the 'parallel' axis), (3) dtype-native sublane
    rounding, (4) in+out double buffers comfortably inside 32 MiB scoped VMEM.
    """
    sub = max(8, 32 // max(1, itemsize))          # 8 f32 / 16 bf16 / 32 int8
    row_bytes = max(1, row_elems * itemsize)
    tb = max(1, (2 * 1024 * 1024) // row_bytes)   # ~2 MiB block target
    tb = min(tb, max(1, (6 * 1024 * 1024) // row_bytes))  # VMEM safety clamp
    if n_rows >= 2 * sub:
        tb = min(tb, n_rows // 2)                 # keep the grid >= 2 steps
    if tb >= n_rows:
        return n_rows
    tb = max(sub, (tb // sub) * sub)
    return min(tb, n_rows)


def max_pool_stride1(x):
    """Pallas TPU implementation of MaxPoolStride1.forward. x: (N, C, H, W)."""
    N, C, H, W = x.shape
    NC, HW = N * C, H * W

    K = _choose_fuse(NC, HW)                      # fuse K slices per row
    NR, ROW = NC // K, K * HW
    xr = x.reshape(NR, ROW)                       # free (contiguous) reshape

    # Replicate-pad edge masks, precomputed once at trace time (no in-kernel
    # div/mod, no per-step full-tile iota).  Shape (1, ROW), int32.
    idx = np.arange(HW, dtype=np.int32)
    col_ok_np = np.tile((idx % W < W - 1).astype(np.int32), K).reshape(1, ROW)
    row_ok_np = np.tile((idx // W < H - 1).astype(np.int32), K).reshape(1, ROW)
    col_ok = jnp.asarray(col_ok_np)
    row_ok = jnp.asarray(row_ok_np)

    TB = _choose_tb(NR, ROW, x.dtype.itemsize)
    kernel = functools.partial(_maxpool_s1_kernel, khw=ROW, w=W)

    io_bytes = 2 * NC * HW * x.dtype.itemsize
    out = pl.pallas_call(
        kernel,
        out_shape=jax.ShapeDtypeStruct((NR, ROW), x.dtype),
        grid_spec=pltpu.PrefetchScalarGridSpec(
            num_scalar_prefetch=0,
            grid=(pl.cdiv(NR, TB),),
            in_specs=[
                pl.BlockSpec((1, ROW), lambda i: (0, 0)),   # col mask (VMEM-resident)
                pl.BlockSpec((1, ROW), lambda i: (0, 0)),   # row mask (VMEM-resident)
                pl.BlockSpec((TB, ROW), lambda i: (i, 0)),  # input tile
            ],
            out_specs=pl.BlockSpec((TB, ROW), lambda i: (i, 0)),
        ),
        compiler_params=pltpu.CompilerParams(
            dimension_semantics=("parallel",),
            vmem_limit_bytes=32 * 1024 * 1024,
        ),
        cost_estimate=pl.CostEstimate(
            flops=4 * NC * HW, transcendentals=0, bytes_accessed=io_bytes),
    )(col_ok, row_ok, xr)
    return out.reshape(N, C, H, W)


def _reference(x):
    # pure-JAX reference: replicate pad right/bottom by 1, then 2x2 max, stride 1
    xp = jnp.pad(x, ((0, 0), (0, 0), (0, 1), (0, 1)), mode="edge")
    return jnp.maximum(
        jnp.maximum(xp[:, :, :-1, :-1], xp[:, :, :-1, 1:]),
        jnp.maximum(xp[:, :, 1:, :-1], xp[:, :, 1:, 1:]),
    )


if __name__ == "__main__":
    key = jax.random.PRNGKey(0)
    x = jax.random.normal(key, (2, 4, 16, 16), dtype=jnp.float32)

    y = max_pool_stride1(x)
    y = jax.block_until_ready(y)

    y_ref = _reference(x)
    assert y.shape == x.shape
    assert jnp.allclose(y, y_ref, atol=1e-6, rtol=1e-6)
    print("KERNEL_OK")
</pallas_src>

<mosaic_0001>
module attributes {stable_mosaic.version = 11 : i64} {
  func.func @_maxpool_s1_kernel(%arg0: i32, %arg1: memref<1x256xi32, #tpu.memory_space<vmem>>, %arg2: memref<1x256xi32, #tpu.memory_space<vmem>>, %arg3: memref<8x256xf32, #tpu.memory_space<vmem>>, %arg4: memref<8x256xf32, #tpu.memory_space<vmem>>) attributes {dimension_semantics = [#tpu.dimension_semantics<parallel>], iteration_bounds = array<i64: 1>, scalar_prefetch = 0 : i64, scratch_operands = 0 : i64, tpu.core_type = #tpu.core_type<tc>, window_params = [{pipeline_mode = #tpu.pipeline_mode<synchronous>, transform_indices = @transform_0, window_bounds = array<i64: 1, 256>}, {pipeline_mode = #tpu.pipeline_mode<synchronous>, transform_indices = @transform_1, window_bounds = array<i64: 1, 256>}, {transform_indices = @transform_2, window_bounds = array<i64: 8, 256>}, {transform_indices = @transform_3, window_bounds = array<i64: 8, 256>}]} {
    %c0 = arith.constant 0 : index
    %c0_0 = arith.constant 0 : index
    %0 = vector.load %arg3[%c0, %c0_0] : memref<8x256xf32, #tpu.memory_space<vmem>>, vector<8x256xf32>
    %c0_1 = arith.constant 0 : index
    %c0_2 = arith.constant 0 : index
    %1 = vector.load %arg1[%c0_1, %c0_2] : memref<1x256xi32, #tpu.memory_space<vmem>>, vector<1x256xi32>
    %c0_i32 = arith.constant 0 : i32
    %2 = vector.broadcast %c0_i32 : i32 to vector<1x256xi32>
    %3 = arith.cmpi ne, %1, %2 : vector<1x256xi32>
    %c0_3 = arith.constant 0 : index
    %c0_4 = arith.constant 0 : index
    %4 = vector.load %arg2[%c0_3, %c0_4] : memref<1x256xi32, #tpu.memory_space<vmem>>, vector<1x256xi32>
    %c0_i32_5 = arith.constant 0 : i32
    %5 = vector.broadcast %c0_i32_5 : i32 to vector<1x256xi32>
    %6 = arith.cmpi ne, %4, %5 : vector<1x256xi32>
    %c255_i32 = arith.constant 255 : i32
    %7 = tpu.dynamic_rotate %0 by %c255_i32 dim 1 : vector<8x256xf32>, i32 -> vector<8x256xf32>
    %8 = vector.shape_cast %3 : vector<1x256xi1> to vector<1x256xi1>
    %9 = vector.broadcast %8 : vector<1x256xi1> to vector<8x256xi1>
    %10 = arith.select %9, %7, %0 : vector<8x256xi1>, vector<8x256xf32>
    %11 = arith.maximumf %0, %10 : vector<8x256xf32>
    %c240_i32 = arith.constant 240 : i32
    %12 = tpu.dynamic_rotate %11 by %c240_i32 dim 1 : vector<8x256xf32>, i32 -> vector<8x256xf32>
    %13 = vector.shape_cast %6 : vector<1x256xi1> to vector<1x256xi1>
    %14 = vector.broadcast %13 : vector<1x256xi1> to vector<8x256xi1>
    %15 = arith.select %14, %12, %11 : vector<8x256xi1>, vector<8x256xf32>
    %16 = arith.maximumf %11, %15 : vector<8x256xf32>
    %c0_6 = arith.constant 0 : index
    %c0_7 = arith.constant 0 : index
    %17 = vector.load %arg4[%c0_6, %c0_7] : memref<8x256xf32, #tpu.memory_space<vmem>>, vector<8x256xf32>
    tpu.vector_store %arg4[%c0_6, %c0_7], %16 {strides = array<i32>} : memref<8x256xf32, #tpu.memory_space<vmem>>, vector<8x256xf32>,
    return
  }
  func.func @transform_0(%arg0: i32) -> (i32, i32) {
    %c0_i32 = arith.constant 0 : i32
    %c0_i32_0 = arith.constant 0 : i32
    %c0_i32_1 = arith.constant 0 : i32
    return %c0_i32, %c0_i32_0 : i32, i32
  }
  func.func @transform_1(%arg0: i32) -> (i32, i32) {
    %c0_i32 = arith.constant 0 : i32
    %c0_i32_0 = arith.constant 0 : i32
    %c0_i32_1 = arith.constant 0 : i32
    return %c0_i32, %c0_i32_0 : i32, i32
  }
  func.func @transform_2(%arg0: i32) -> (i32, i32) {
    %c0_i32 = arith.constant 0 : i32
    %c0_i32_0 = arith.constant 0 : i32
    return %arg0, %c0_i32 : i32, i32
  }
  func.func @transform_3(%arg0: i32) -> (i32, i32) {
    %c0_i32 = arith.constant 0 : i32
    %c0_i32_0 = arith.constant 0 : i32
    return %arg0, %c0_i32 : i32, i32
  }
}

</mosaic_0001>

<bundles_post_ra>
// kernel: tpu_custom_call.1
= control target key start
LH: loop header
LB: loop body
LE: loop exit
PB: predicated region body
PF: predicated region fallthrough
CT: control target
= control target key end

     0   :  { %8 = vsyncpa [#allocation3], 0  ;;  %s264_s0 = inlined_call_operand.hbm [shape: s32[1,256], index: 0, kind: input, shape index: {}]   ;;  %s265_s1 = inlined_call_operand.hbm [shape: s32[1,256], index: 1, kind: input, shape index: {}]   ;;  %s266_s2 = inlined_call_operand.hbm [shape: f32[8,256], index: 2, kind: input, shape index: {}]   ;;  %s267_s3 = inlined_call_operand.hbm [shape: f32[8,256], index: 3, kind: output, shape index: {}]  }
   0x1   :  { %9 = vsyncpa [#allocation6], 0  ;;  %s27_s14 = sshll.u32 %s265_s1, 4  ;;  %s28_s14 = int_to_ptr.hbm [resolvable:$true] %s27_s14 }
   0x2   :  { %10 = vsyncpa [#allocation4], 0  ;;  %s225_s15 = smov [#allocation5]   ;;  %s16_s19 = sshll.u32 %s264_s0, 4  ;;  %s17_s19 = int_to_ptr.hbm [resolvable:$true] %s16_s19 }
   0x3   :  { %s29_s16 = sshll.u32 %s225_s15, 4  ;;  %s226_s20 = smov [#allocation2]   ;;  %s30_s16 = int_to_ptr.vmem [resolvable:$true] %s29_s16 }
   0x4   :  { %32 = dma.hbm_to_vmem [thread:$0]  %s28_s14, 32, %s30_s16, [#allocation6]  }
   0x5   :  { %s18_s21 = sshll.u32 %s226_s20, 4  ;;  %s38_s24 = sshll.u32 %s266_s2, 4  ;;  %s19_s21 = int_to_ptr.vmem [resolvable:$true] %s18_s21  ;;  %s39_s24 = int_to_ptr.hbm [resolvable:$true] %s38_s24 }
   0x6   :  { %21 = dma.hbm_to_vmem [thread:$0]  %s17_s19, 32, %s19_s21, [#allocation3]  }
   0x7   :  { %s227_s1 = smov [#allocation7]  }
   0x8   :  { %s40_s25 = sshll.u32 %s227_s1, 4  ;;  %s41_s25 = int_to_ptr.vmem [resolvable:$true] %s40_s25 }
   0x9   :  { %43 = dma.hbm_to_vmem [thread:$0]  %s39_s24, 256, %s41_s25, [#allocation6]  }
   0xa   :  { %219 = dma.done.wait [#allocation3], 32  }
   0xb   :  { %220 = vsyncadd [#allocation3], 4294967264 }
   0xc   :  { %221 = dma.done.wait [#allocation6], 288  }
   0xd   :  { %222 = vsyncadd [#allocation6], 4294967008  ;;  %v56_v0 = vld [vmem:[#allocation7] sm:$0xff]  ;;  %s228_s0 = smov 127   ;;  %v57_v1 = vld [vmem:[#allocation7 + $0x8] sm:$0xff]  ;;  %v66_v3 = vlaneseq  ;;  %v229_v5 = vmov 0  }
   0xe   :  { %62 = vrot.lane.b32.xlu0 %v56_v0, %s228_s0  ;;  %v58_v2 = vld [vmem:[#allocation2] sm:$0x3]  ;;  %s230_s2 = smov 112   ;;  %v60_v17 = vld [vmem:[#allocation5] sm:$0x3]  ;;  %s231_s26 = smov [#allocation8]  }
   0xf   :  { %vm59_vm0 = vcmp.ne.s32.totalorder %v58_v2, 0  ;;  %v67_v7 = vand.u32 127, %v66_v3  ;;  %vm61_vm4 = vcmp.ne.s32.totalorder %v60_v17, 0  ;;  %s103_s27 = sshll.u32 %s231_s26, 4  ;;  %s105_s30 = sshll.u32 %s267_s3, 4  ;;  %s104_s27 = int_to_ptr.vmem [resolvable:$true] %s103_s27  ;;  %s106_s30 = int_to_ptr.hbm [resolvable:$true] %s105_s30 }
  0x10   :  { %v71_v6 = vsel %vm59_vm0, 1, %v229_v5  ;;  %v87_v19 = vsel %vm61_vm4, 1, %v229_v5 }
  0x11   :  { %v72_v8 = vperm.slane %v71_v6, 0  ;;  %vm68_vm1 = vcmp.lt.s32.totalorder %v67_v7, 127  ;;  %v73_v10 = vperm.slane %v71_v6, 1  ;;  %v88_v20 = vperm.slane %v87_v19, 0 }
  0x12   :  { %v89_v21 = vperm.slane %v87_v19, 1  ;;  %vm84_vm5 = vcmp.lt.s32.totalorder %v67_v7, 112 }
  0x13   :  { %vm74_vm2 = vcmp.eq.s32.totalorder %v72_v8, 1  ;;  %vm75_vm3 = vcmp.eq.s32.totalorder %v73_v10, 1  ;;  %vm90_vm6 = vcmp.eq.s32.totalorder %v88_v20, 1 }
  0x14   :  { %vm91_vm7 = vcmp.eq.s32.totalorder %v89_v21, 1 }
  0x16   :  { %64 = vrot.lane.b32.xlu0 %v57_v1, %s228_s0 }
  0x80   :  { %v63_v4 = vpop.permute.xlu0 %62 }
  0x88   :  { %v65_v9 = vpop.permute.xlu0 %64 }
  0x89   :  { %v69_v11 = vsel %vm68_vm1, %v63_v4, %v65_v9  ;;  %v70_v14 = vsel %vm68_vm1, %v65_v9, %v63_v4 }
  0x8a   :  { %v76_v12 = vsel %vm74_vm2, %v69_v11, %v56_v0  ;;  %v77_v15 = vsel %vm75_vm3, %v70_v14, %v57_v1 }
  0x8b   :  { %v78_v13 = vmax.f32 %v56_v0, %v76_v12  ;;  %v79_v16 = vmax.f32 %v57_v1, %v77_v15 }
  0x8d   :  { %80 = vrot.lane.b32.xlu1 %v78_v13, %s230_s2 }
  0x95   :  { %82 = vrot.lane.b32.xlu1 %v79_v16, %s230_s2 }
  0xff   :  { %v81_v18 = vpop.permute.xlu1 %80 }
 0x107   :  { %v83_v22 = vpop.permute.xlu1 %82 }
 0x108   :  { %v85_v23 = vsel %vm84_vm5, %v81_v18, %v83_v22  ;;  %v86_v24 = vsel %vm84_vm5, %v83_v22, %v81_v18 }
 0x109   :  { %v92_v25 = vsel %vm90_vm6, %v85_v23, %v78_v13  ;;  %v93_v26 = vsel %vm91_vm7, %v86_v24, %v79_v16 }
 0x10a   :  { %v94_v27 = vmax.f32 %v78_v13, %v92_v25  ;;  %v95_v28 = vmax.f32 %v79_v16, %v93_v26 }
 0x10c   :  { %96 = vst [vmem:[#allocation8] sm:$0xff] %v94_v27 }
 0x10d   :  { %97 = vst [vmem:[#allocation8 + $0x8] sm:$0xff] %v95_v28 }
 0x10e   :  { %108 = dma.vmem_to_hbm [thread:$0]  %s104_s27, 256, %s106_s30, [#allocation4]  }
 0x10f   :  { %223 = dma.done.wait [#allocation4], 256  }
 0x110   :  { %224 = vsyncadd [#allocation4], 4294967040 }
 0x111   :  { %113 = vsyncpa [#allocation3], 1 }
 0x112   :  { %114 = vsyncpa [#allocation6], 1 }
 0x113   :  { %115 = vsyncpa [#allocation4], 1 }

</bundles_post_ra>
